<compile_context>
chip_gen: v5e
topology: v5e:2x2
jax: 0.10.0
libtpu: 0.0.40
codegen_flags: <defaults>
</compile_context>

<pallas_src>
import functools

import jax
import jax.numpy as jnp
import numpy as np
from jax.experimental import pallas as pl
from jax.experimental.pallas import tpu as pltpu

EPS = 1e-5          # nn.GroupNorm default eps
NUM_GROUPS = 2      # nn.GroupNorm(2, latent_channels)


def _sublane_block_allreduce(v, block):
    """Sum within aligned groups of `block` consecutive sublanes.

    `block` must be a power of two and divide v.shape[0]; groups start at
    multiples of `block`.  After log2(block) XOR-partner butterfly steps every
    row of a group holds the group sum (so the "broadcast back" is free).
    Uses pltpu.roll (XLU) -- no sublane concatenates, no MXU.
    """
    if block == 1:
        return v
    rows = v.shape[0]
    row_id = jax.lax.broadcasted_iota(jnp.int32, (rows, 1), 0)
    step = 1
    while step < block:
        up = pltpu.roll(v, shift=(rows - step) % rows, axis=0)   # v[(r + step) % rows]
        dn = pltpu.roll(v, shift=step, axis=0)                   # v[(r - step) % rows]
        # Row r's partner is r XOR step; within aligned power-of-two blocks the
        # wrap-around of the roll is never selected.
        v = v + jnp.where((row_id & step) == 0, up, dn)
        step *= 2
    return v


def cross_attn_kernel(x_ref, cond_ref, w_ref, out_ref, *, C, D, groups):
    x = x_ref[...]                          # (R, N)  rows = (sample, channel)
    cond = cond_ref[...]                    # (R, D)  sample's cond repeated on its C rows
    R, N = x.shape
    cg = C // groups

    a_mat = w_ref[:, 0:D]                   # (R, D)  Wq^T Wk  (tiled per packed sample)
    b_mat = w_ref[:, D:2 * D]               # (R, D)  Wo  Wv
    cols = w_ref[:, 2 * D:]                 # (R, 5)  gamma | beta | bo | Wq^T bk | Wo bv
    gamma = cols[:, 0:1]
    beta = cols[:, 1:2]
    bo = cols[:, 2:3]
    kq_bias = cols[:, 3:4]
    vo_bias = cols[:, 4:5]

    # ---- GroupNorm(groups, C): two-pass, per-group stats via sublane butterfly ----
    inv_cnt = 1.0 / (cg * N)
    s1 = jnp.sum(x, axis=1, keepdims=True)                     # (R, 1) per-row sum
    mean = _sublane_block_allreduce(s1, cg) * inv_cnt          # (R, 1) group mean per row
    xc = x - mean
    s2 = jnp.sum(xc * xc, axis=1, keepdims=True)               # (R, 1)
    var = _sublane_block_allreduce(s2, cg) * inv_cnt           # biased variance (matches torch)
    h = xc * (jax.lax.rsqrt(var + EPS) * gamma) + beta         # (R, N)

    # ---- per-row projection coefficients (q/k/v/h2 never materialized) ----
    # kq_row = Wq^T (Wk cond + bk) ; vo_row = Wo (Wv cond + bv)   -- lane reduces only
    kq_row = jnp.sum(a_mat * cond, axis=1, keepdims=True) + kq_bias   # (R, 1)
    vo_row = jnp.sum(b_mat * cond, axis=1, keepdims=True) + vo_bias   # (R, 1)

    # ---- attention logits: w[s,n] = sum_c kq[s,c] * h[s,c,n]  (bq term is a
    # per-sample constant over n -> cancelled by the softmax -> dropped) ----
    logits = _sublane_block_allreduce(kq_row * h, C)           # (R, N), same row content per sample

    # ---- softmax over the N spatial positions (redundant per row == free:
    # the result must be broadcast to all C rows of the sample anyway) ----
    m = jnp.max(logits, axis=1, keepdims=True)                 # (R, 1)
    e = jnp.exp(logits - m)                                    # (R, N)
    den = jnp.sum(e, axis=1, keepdims=True)                    # (R, 1), >= 1
    inv_den = pl.reciprocal(den, approx=True)                  # EUP reciprocal
    inv_den = inv_den * (2.0 - den * inv_den)                  # one Newton step

    # ---- out = x + proj_out(v p^T) + bo = x + bo + (Wo v / den) * e ----
    out_ref[...] = x + bo + (vo_row * inv_den) * e


def cross_attention_block(x, cond, params, *, samples_per_block=None,
                          num_groups=NUM_GROUPS):
    """x: (B, C, H, W) NCHW float32; cond: (B, cond_dim) float32."""
    B, C, H, W = x.shape
    N = H * W
    D = cond.shape[-1]

    # Single grid step by default: this kernel is launch/DMA-latency bound, and
    # packing all samples onto the sublane axis fills fp32 (8,128) tiles.
    bb = B if samples_per_block is None else samples_per_block
    assert B % bb == 0
    R = bb * C
    assert bb == B or R % 8 == 0, "block sublane dim must fill (8,128) tiles"
    cg = C // num_groups
    assert C & (C - 1) == 0 and cg & (cg - 1) == 0, "butterfly needs power-of-two groups"

    # Host-side layout packing: 2-D sample-major slabs, lane axis = N / D.
    x2 = x.reshape(B * C, N)                        # rows = (sample, channel)
    cond_rep = jnp.repeat(cond, C, axis=0)          # (B*C, D): sample's cond on each of its rows

    # Host-side algebraic folding + single packed weight operand.
    a_mat = params["wq"].T @ params["wk"]           # (C, D)  Wq^T Wk
    b_mat = params["wo"] @ params["wv"]             # (C, D)  Wo  Wv
    kq_bias = params["wq"].T @ params["bk"]         # (C,)    Wq^T bk
    vo_bias = params["wo"] @ params["bv"]           # (C,)    Wo  bv
    cols = jnp.stack([params["gamma"], params["beta"], params["bo"],
                      kq_bias, vo_bias], axis=1)    # (C, 5)
    wbig = jnp.concatenate([a_mat, b_mat, cols], axis=1)   # (C, 2D+5)
    wbig = jnp.tile(wbig, (bb, 1))                  # (R, 2D+5) tiled across packed samples
    # (bq is intentionally unused: it only shifts all N logits of a sample
    #  equally, which softmax over N cancels.)

    kernel = functools.partial(cross_attn_kernel, C=C, D=D, groups=num_groups)

    cost = pl.CostEstimate(
        flops=int(B * C * N * 16 + B * C * D * 4),
        transcendentals=int(B * C * N),
        bytes_accessed=int(4 * (2 * B * C * N + B * C * D + R * (2 * D + 5))),
    )

    out2 = pl.pallas_call(
        kernel,
        out_shape=jax.ShapeDtypeStruct((B * C, N), x.dtype),
        grid_spec=pltpu.PrefetchScalarGridSpec(
            num_scalar_prefetch=0,
            grid=(B // bb,),
            in_specs=[
                pl.BlockSpec((R, N), lambda b: (b, 0)),           # x  (packed rows)
                pl.BlockSpec((R, D), lambda b: (b, 0)),           # cond (row-expanded)
                pl.BlockSpec((R, 2 * D + 5), lambda b: (0, 0)),   # packed weights (one DMA)
            ],
            out_specs=pl.BlockSpec((R, N), lambda b: (b, 0)),
        ),
        compiler_params=pltpu.CompilerParams(dimension_semantics=("parallel",)),
        cost_estimate=cost,
    )(x2, cond_rep, wbig)
    return out2.reshape(B, C, H, W)


def reference(x, cond, params):
    """Plain-JAX reference mirroring the PyTorch forward exactly."""
    B, C, H, W = x.shape
    G = NUM_GROUPS
    xg = x.reshape(B, G, C // G, H, W)
    m = xg.mean(axis=(2, 3, 4), keepdims=True)
    var = ((xg - m) ** 2).mean(axis=(2, 3, 4), keepdims=True)
    h = ((xg - m) / jnp.sqrt(var + EPS)).reshape(B, C, H, W)
    h = h * params["gamma"][None, :, None, None] + params["beta"][None, :, None, None]
    q = jnp.einsum("oc,bchw->bohw", params["wq"], h) + params["bq"][None, :, None, None]
    q = q.reshape(B, C, -1)
    k = cond @ params["wk"].T + params["bk"]     # (B, C)
    v = cond @ params["wv"].T + params["bv"]     # (B, C)
    w = jnp.einsum("bcn,bc->bn", q, k)           # (B, N)
    p = jax.nn.softmax(w, axis=-1)
    h2 = (v[:, :, None] * p[:, None, :]).reshape(B, C, H, W)
    out = x + jnp.einsum("oc,bchw->bohw", params["wo"], h2) \
            + params["bo"][None, :, None, None]
    return out


if __name__ == "__main__":
    B, C, H, W, D = 2, 4, 16, 16, 256   # latent_channels=4, cond_dim=256
    key = jax.random.PRNGKey(0)
    keys = jax.random.split(key, 12)

    x = jax.random.normal(keys[0], (B, C, H, W), jnp.float32)
    cond = jax.random.normal(keys[1], (B, D), jnp.float32)

    params = dict(
        gamma=1.0 + 0.1 * jax.random.normal(keys[2], (C,), jnp.float32),
        beta=0.1 * jax.random.normal(keys[3], (C,), jnp.float32),
        wq=0.2 * jax.random.normal(keys[4], (C, C), jnp.float32),
        bq=0.1 * jax.random.normal(keys[5], (C,), jnp.float32),
        wk=0.05 * jax.random.normal(keys[6], (C, D), jnp.float32),
        bk=0.1 * jax.random.normal(keys[7], (C,), jnp.float32),
        wv=0.05 * jax.random.normal(keys[8], (C, D), jnp.float32),
        bv=0.1 * jax.random.normal(keys[9], (C,), jnp.float32),
        wo=0.2 * jax.random.normal(keys[10], (C, C), jnp.float32),
        bo=0.1 * jax.random.normal(keys[11], (C,), jnp.float32),
    )

    out = jax.block_until_ready(cross_attention_block(x, cond, params))
    ref = reference(x, cond, params)
    np.testing.assert_allclose(np.asarray(out), np.asarray(ref), rtol=1e-5, atol=1e-5)
    print("KERNEL_OK")
</pallas_src>

<mosaic_0001>
module attributes {stable_mosaic.version = 11 : i64} {
  func.func @cross_attn_kernel(%arg0: i32, %arg1: memref<8x256xf32, #tpu.memory_space<vmem>>, %arg2: memref<8x256xf32, #tpu.memory_space<vmem>>, %arg3: memref<8x517xf32, #tpu.memory_space<vmem>>, %arg4: memref<8x256xf32, #tpu.memory_space<vmem>>) attributes {dimension_semantics = [#tpu.dimension_semantics<parallel>], iteration_bounds = array<i64: 1>, scalar_prefetch = 0 : i64, scratch_operands = 0 : i64, tpu.core_type = #tpu.core_type<tc>, window_params = [{transform_indices = @transform_0, window_bounds = array<i64: 8, 256>}, {transform_indices = @transform_1, window_bounds = array<i64: 8, 256>}, {pipeline_mode = #tpu.pipeline_mode<synchronous>, transform_indices = @transform_2, window_bounds = array<i64: 8, 517>}, {transform_indices = @transform_3, window_bounds = array<i64: 8, 256>}]} {
    %c0 = arith.constant 0 : index
    %c0_0 = arith.constant 0 : index
    %0 = vector.load %arg1[%c0, %c0_0] : memref<8x256xf32, #tpu.memory_space<vmem>>, vector<8x256xf32>
    %c0_1 = arith.constant 0 : index
    %c0_2 = arith.constant 0 : index
    %1 = vector.load %arg2[%c0_1, %c0_2] : memref<8x256xf32, #tpu.memory_space<vmem>>, vector<8x256xf32>
    %c0_3 = arith.constant 0 : index
    %c0_4 = arith.constant 0 : index
    %2 = vector.load %arg3[%c0_3, %c0_4] : memref<8x517xf32, #tpu.memory_space<vmem>>, vector<8x256xf32>
    %c0_5 = arith.constant 0 : index
    %c256 = arith.constant 256 : index
    %3 = vector.load %arg3[%c0_5, %c256] : memref<8x517xf32, #tpu.memory_space<vmem>>, vector<8x256xf32>
    %c0_6 = arith.constant 0 : index
    %c512 = arith.constant 512 : index
    %4 = vector.load %arg3[%c0_6, %c512] : memref<8x517xf32, #tpu.memory_space<vmem>>, vector<8x5xf32>
    %5 = vector.extract_strided_slice %4 {offsets = [0, 0], sizes = [8, 1], strides = [1, 1]} : vector<8x5xf32> to vector<8x1xf32>
    %6 = vector.extract_strided_slice %4 {offsets = [0, 1], sizes = [8, 1], strides = [1, 1]} : vector<8x5xf32> to vector<8x1xf32>
    %7 = vector.extract_strided_slice %4 {offsets = [0, 2], sizes = [8, 1], strides = [1, 1]} : vector<8x5xf32> to vector<8x1xf32>
    %8 = vector.extract_strided_slice %4 {offsets = [0, 3], sizes = [8, 1], strides = [1, 1]} : vector<8x5xf32> to vector<8x1xf32>
    %9 = vector.extract_strided_slice %4 {offsets = [0, 4], sizes = [8, 1], strides = [1, 1]} : vector<8x5xf32> to vector<8x1xf32>
    %cst = arith.constant dense<0.000000e+00> : vector<8xf32>
    %10 = vector.multi_reduction <add>, %0, %cst [1] : vector<8x256xf32> to vector<8xf32>
    %11 = vector.shape_cast %10 : vector<8xf32> to vector<8x1xf32>
    %12 = tpu.iota {dimensions = array<i32: 0>} : vector<8x1xi32>
    %c7_i32 = arith.constant 7 : i32
    %13 = tpu.dynamic_rotate %11 by %c7_i32 dim 0 : vector<8x1xf32>, i32 -> vector<8x1xf32>
    %c1_i32 = arith.constant 1 : i32
    %14 = tpu.dynamic_rotate %11 by %c1_i32 dim 0 : vector<8x1xf32>, i32 -> vector<8x1xf32>
    %c1_i32_7 = arith.constant 1 : i32
    %15 = vector.broadcast %c1_i32_7 : i32 to vector<8x1xi32>
    %16 = arith.andi %12, %15 : vector<8x1xi32>
    %c0_i32 = arith.constant 0 : i32
    %17 = vector.broadcast %c0_i32 : i32 to vector<8x1xi32>
    %18 = arith.cmpi eq, %16, %17 : vector<8x1xi32>
    %19 = arith.select %18, %13, %14 : vector<8x1xi1>, vector<8x1xf32>
    %20 = arith.addf %11, %19 : vector<8x1xf32>
    %cst_8 = arith.constant 0.001953125 : f32
    %21 = vector.broadcast %cst_8 : f32 to vector<8x1xf32>
    %22 = arith.mulf %20, %21 : vector<8x1xf32>
    %23 = vector.broadcast %22 : vector<8x1xf32> to vector<8x256xf32>
    %24 = arith.subf %0, %23 : vector<8x256xf32>
    %25 = arith.mulf %24, %24 : vector<8x256xf32>
    %cst_9 = arith.constant dense<0.000000e+00> : vector<8xf32>
    %26 = vector.multi_reduction <add>, %25, %cst_9 [1] : vector<8x256xf32> to vector<8xf32>
    %27 = vector.shape_cast %26 : vector<8xf32> to vector<8x1xf32>
    %28 = tpu.iota {dimensions = array<i32: 0>} : vector<8x1xi32>
    %c7_i32_10 = arith.constant 7 : i32
    %29 = tpu.dynamic_rotate %27 by %c7_i32_10 dim 0 : vector<8x1xf32>, i32 -> vector<8x1xf32>
    %c1_i32_11 = arith.constant 1 : i32
    %30 = tpu.dynamic_rotate %27 by %c1_i32_11 dim 0 : vector<8x1xf32>, i32 -> vector<8x1xf32>
    %c1_i32_12 = arith.constant 1 : i32
    %31 = vector.broadcast %c1_i32_12 : i32 to vector<8x1xi32>
    %32 = arith.andi %28, %31 : vector<8x1xi32>
    %c0_i32_13 = arith.constant 0 : i32
    %33 = vector.broadcast %c0_i32_13 : i32 to vector<8x1xi32>
    %34 = arith.cmpi eq, %32, %33 : vector<8x1xi32>
    %35 = arith.select %34, %29, %30 : vector<8x1xi1>, vector<8x1xf32>
    %36 = arith.addf %27, %35 : vector<8x1xf32>
    %cst_14 = arith.constant 0.001953125 : f32
    %37 = vector.broadcast %cst_14 : f32 to vector<8x1xf32>
    %38 = arith.mulf %36, %37 : vector<8x1xf32>
    %cst_15 = arith.constant 9.99999974E-6 : f32
    %39 = vector.broadcast %cst_15 : f32 to vector<8x1xf32>
    %40 = arith.addf %38, %39 : vector<8x1xf32>
    %41 = math.rsqrt %40 : vector<8x1xf32>
    %42 = arith.mulf %41, %5 : vector<8x1xf32>
    %43 = vector.broadcast %42 : vector<8x1xf32> to vector<8x256xf32>
    %44 = arith.mulf %24, %43 : vector<8x256xf32>
    %45 = vector.broadcast %6 : vector<8x1xf32> to vector<8x256xf32>
    %46 = arith.addf %44, %45 : vector<8x256xf32>
    %47 = arith.mulf %2, %1 : vector<8x256xf32>
    %cst_16 = arith.constant dense<0.000000e+00> : vector<8xf32>
    %48 = vector.multi_reduction <add>, %47, %cst_16 [1] : vector<8x256xf32> to vector<8xf32>
    %49 = vector.shape_cast %48 : vector<8xf32> to vector<8x1xf32>
    %50 = arith.addf %49, %8 : vector<8x1xf32>
    %51 = arith.mulf %3, %1 : vector<8x256xf32>
    %cst_17 = arith.constant dense<0.000000e+00> : vector<8xf32>
    %52 = vector.multi_reduction <add>, %51, %cst_17 [1] : vector<8x256xf32> to vector<8xf32>
    %53 = vector.shape_cast %52 : vector<8xf32> to vector<8x1xf32>
    %54 = arith.addf %53, %9 : vector<8x1xf32>
    %55 = vector.broadcast %50 : vector<8x1xf32> to vector<8x256xf32>
    %56 = arith.mulf %55, %46 : vector<8x256xf32>
    %57 = tpu.iota {dimensions = array<i32: 0>} : vector<8x1xi32>
    %c7_i32_18 = arith.constant 7 : i32
    %58 = tpu.dynamic_rotate %56 by %c7_i32_18 dim 0 : vector<8x256xf32>, i32 -> vector<8x256xf32>
    %c1_i32_19 = arith.constant 1 : i32
    %59 = tpu.dynamic_rotate %56 by %c1_i32_19 dim 0 : vector<8x256xf32>, i32 -> vector<8x256xf32>
    %c1_i32_20 = arith.constant 1 : i32
    %60 = vector.broadcast %c1_i32_20 : i32 to vector<8x1xi32>
    %61 = arith.andi %57, %60 : vector<8x1xi32>
    %c0_i32_21 = arith.constant 0 : i32
    %62 = vector.broadcast %c0_i32_21 : i32 to vector<8x1xi32>
    %63 = arith.cmpi eq, %61, %62 : vector<8x1xi32>
    %64 = vector.shape_cast %63 : vector<8x1xi1> to vector<8x1xi1>
    %65 = vector.broadcast %64 : vector<8x1xi1> to vector<8x256xi1>
    %66 = arith.select %65, %58, %59 : vector<8x256xi1>, vector<8x256xf32>
    %67 = arith.addf %56, %66 : vector<8x256xf32>
    %c6_i32 = arith.constant 6 : i32
    %68 = tpu.dynamic_rotate %67 by %c6_i32 dim 0 : vector<8x256xf32>, i32 -> vector<8x256xf32>
    %c2_i32 = arith.constant 2 : i32
    %69 = tpu.dynamic_rotate %67 by %c2_i32 dim 0 : vector<8x256xf32>, i32 -> vector<8x256xf32>
    %c2_i32_22 = arith.constant 2 : i32
    %70 = vector.broadcast %c2_i32_22 : i32 to vector<8x1xi32>
    %71 = arith.andi %57, %70 : vector<8x1xi32>
    %c0_i32_23 = arith.constant 0 : i32
    %72 = vector.broadcast %c0_i32_23 : i32 to vector<8x1xi32>
    %73 = arith.cmpi eq, %71, %72 : vector<8x1xi32>
    %74 = vector.shape_cast %73 : vector<8x1xi1> to vector<8x1xi1>
    %75 = vector.broadcast %74 : vector<8x1xi1> to vector<8x256xi1>
    %76 = arith.select %75, %68, %69 : vector<8x256xi1>, vector<8x256xf32>
    %77 = arith.addf %67, %76 : vector<8x256xf32>
    %cst_24 = arith.constant dense<0xFF800000> : vector<8xf32>
    %78 = vector.multi_reduction <maximumf>, %77, %cst_24 [1] : vector<8x256xf32> to vector<8xf32>
    %79 = vector.shape_cast %78 : vector<8xf32> to vector<8x1xf32>
    %80 = vector.broadcast %79 : vector<8x1xf32> to vector<8x256xf32>
    %81 = arith.subf %77, %80 : vector<8x256xf32>
    %82 = math.exp %81 : vector<8x256xf32>
    %cst_25 = arith.constant dense<0.000000e+00> : vector<8xf32>
    %83 = vector.multi_reduction <add>, %82, %cst_25 [1] : vector<8x256xf32> to vector<8xf32>
    %84 = vector.shape_cast %83 : vector<8xf32> to vector<8x1xf32>
    %85 = tpu.reciprocal %84 {approx = true} : vector<8x1xf32> -> vector<8x1xf32>
    %86 = arith.mulf %84, %85 : vector<8x1xf32>
    %cst_26 = arith.constant 2.000000e+00 : f32
    %87 = vector.broadcast %cst_26 : f32 to vector<8x1xf32>
    %88 = arith.subf %87, %86 : vector<8x1xf32>
    %89 = arith.mulf %85, %88 : vector<8x1xf32>
    %90 = vector.broadcast %7 : vector<8x1xf32> to vector<8x256xf32>
    %91 = arith.addf %0, %90 : vector<8x256xf32>
    %92 = arith.mulf %54, %89 : vector<8x1xf32>
    %93 = vector.broadcast %92 : vector<8x1xf32> to vector<8x256xf32>
    %94 = arith.mulf %93, %82 : vector<8x256xf32>
    %95 = arith.addf %91, %94 : vector<8x256xf32>
    %c0_27 = arith.constant 0 : index
    %c0_28 = arith.constant 0 : index
    %96 = vector.load %arg4[%c0_27, %c0_28] : memref<8x256xf32, #tpu.memory_space<vmem>>, vector<8x256xf32>
    tpu.vector_store %arg4[%c0_27, %c0_28], %95 {strides = array<i32>} : memref<8x256xf32, #tpu.memory_space<vmem>>, vector<8x256xf32>,
    return
  }
  func.func @transform_0(%arg0: i32) -> (i32, i32) {
    %c0_i32 = arith.constant 0 : i32
    %c0_i32_0 = arith.constant 0 : i32
    return %arg0, %c0_i32 : i32, i32
  }
  func.func @transform_1(%arg0: i32) -> (i32, i32) {
    %c0_i32 = arith.constant 0 : i32
    %c0_i32_0 = arith.constant 0 : i32
    return %arg0, %c0_i32 : i32, i32
  }
  func.func @transform_2(%arg0: i32) -> (i32, i32) {
    %c0_i32 = arith.constant 0 : i32
    %c0_i32_0 = arith.constant 0 : i32
    %c0_i32_1 = arith.constant 0 : i32
    return %c0_i32, %c0_i32_0 : i32, i32
  }
  func.func @transform_3(%arg0: i32) -> (i32, i32) {
    %c0_i32 = arith.constant 0 : i32
    %c0_i32_0 = arith.constant 0 : i32
    return %arg0, %c0_i32 : i32, i32
  }
}

</mosaic_0001>

<bundles_post_ra>
// kernel: tpu_custom_call.1
= control target key start
LH: loop header
LB: loop body
LE: loop exit
PB: predicated region body
PF: predicated region fallthrough
CT: control target
= control target key end

     0   :  { %8 = vsyncpa [#allocation3], 0  ;;  %s421_s0 = inlined_call_operand.hbm [shape: f32[8,256], index: 0, kind: input, shape index: {}]   ;;  %s422_s1 = inlined_call_operand.hbm [shape: f32[8,256], index: 1, kind: input, shape index: {}]   ;;  %s423_s2 = inlined_call_operand.hbm [shape: f32[8,517], index: 2, kind: input, shape index: {}]   ;;  %s424_s3 = inlined_call_operand.hbm [shape: f32[8,256], index: 3, kind: output, shape index: {}]  }
   0x1   :  { %9 = vsyncpa [#allocation6], 0  ;;  %s27_s14 = sshll.u32 %s422_s1, 4  ;;  %s28_s14 = int_to_ptr.hbm [resolvable:$true] %s27_s14 }
   0x2   :  { %10 = vsyncpa [#allocation4], 0  ;;  %s339_s15 = smov [#allocation5]   ;;  %s16_s19 = sshll.u32 %s421_s0, 4  ;;  %s17_s19 = int_to_ptr.hbm [resolvable:$true] %s16_s19 }
   0x3   :  { %s29_s16 = sshll.u32 %s339_s15, 4  ;;  %s340_s20 = smov [#allocation2]   ;;  %s30_s16 = int_to_ptr.vmem [resolvable:$true] %s29_s16 }
   0x4   :  { %32 = dma.hbm_to_vmem [thread:$0]  %s28_s14, 256, %s30_s16, [#allocation6]  }
   0x5   :  { %s18_s21 = sshll.u32 %s340_s20, 4  ;;  %s38_s24 = sshll.u32 %s423_s2, 4  ;;  %s19_s21 = int_to_ptr.vmem [resolvable:$true] %s18_s21  ;;  %s39_s24 = int_to_ptr.hbm [resolvable:$true] %s38_s24 }
   0x6   :  { %21 = dma.hbm_to_vmem [thread:$0]  %s17_s19, 256, %s19_s21, [#allocation3]  }
   0x7   :  { %s341_s1 = smov [#allocation7]  }
   0x8   :  { %s40_s25 = sshll.u32 %s341_s1, 4  ;;  %s41_s25 = int_to_ptr.vmem [resolvable:$true] %s40_s25 }
   0x9   :  { %43 = dma.hbm_to_vmem [thread:$0]  %s39_s24, 640, %s41_s25, [#allocation6]  }
   0xa   :  { %333 = dma.done.wait [#allocation3], 256  }
   0xb   :  { %334 = vsyncadd [#allocation3], 4294967040 }
   0xc   :  { %335 = dma.done.wait [#allocation6], 896  }
   0xd   :  { %336 = vsyncadd [#allocation6], 4294966400  ;;  %v377_v0 = vld [vmem:[#allocation2] sm:$0xff]  ;;  %v379_v1 = vld [vmem:[#allocation2 + $0x8] sm:$0xff]  ;;  %v342_v3 = vmov 0   ;;  %v68_v4 = vlaneseq  ;;  %v343_v27 = vmov 3  }
   0xe   :  { %v65_v2 = vadd.f32 %v379_v1, %v377_v0  ;;  %222 = vset.pattern.permute.xlu0 %v342_v3  ;;  %223 = vset.pattern.permute.xlu2 %v342_v3  ;;  %v394_v19 = vld [vmem:[#allocation5] sm:$0xff]  ;;  %v396_v20 = vld [vmem:[#allocation5 + $0x8] sm:$0xff]  ;;  %v60_v21 = vld [vmem:[#allocation7] sm:$0xff]  ;;  %v344_v46 = vmov 1   ;;  %s347_s0 = smov [#allocation8]   ;;  %s202_s28 = sshll.u32 %s424_s3, 4  ;;  %s203_s28 = int_to_ptr.hbm [resolvable:$true] %s202_s28 }
   0xf   :  { %v383_v5 = vshrl.u32 %v68_v4, 7  ;;  %v61_v22 = vld [vmem:[#allocation7 + $0x8] sm:$0xff]  ;;  %v120_v24 = vmul.f32 %v60_v21, %v394_v19  ;;  %225 = vset.pattern.permute.xlu1 %v343_v27  ;;  %v402_v34 = vld [vmem:[#allocation7 + $0x20] sm:$0xff]  ;;  %v345_v27 = vmov 2   ;;  %s200_s2 = sshll.u32 %s347_s0, 4  ;;  %s201_s2 = int_to_ptr.vmem [resolvable:$true] %s200_s2 }
  0x10   :  { %66 = vadd.xlane.f32.xlu0 %v65_v2  ;;  %v121_v25 = vmul.f32 %v61_v22, %v396_v20 }
  0x11   :  { %v72_v6 = vand.u32 1, %v383_v5  ;;  %v153_v56 = vand.u32 2, %v383_v5 }
  0x12   :  { %v122_v26 = vadd.f32 %v121_v25, %v120_v24 }
  0x13   :  { %vm386_vm0 = vcmp.eq.s32.totalorder %v72_v6, 0  ;;  %vm154_vm4 = vcmp.eq.s32.totalorder %v153_v56, 0 }
  0x83   :  { %v67_v8 = vpop.xlane.xlu0 %66 }
  0x84   :  { %v70_v9 = vrot.slane %v67_v8, 1  ;;  %v71_v10 = vrot.slane %v67_v8, 7 }
  0x86   :  { %v74_v11 = vsel %vm386_vm0, %v70_v9, %v71_v10 }
  0x87   :  { %v75_v12 = vadd.f32 %v74_v11, %v67_v8 }
  0x89   :  { %v76_v13 = vmul.f32 0.001953125, %v75_v12 }
  0x8b   :  { %79 = vperm.xlu0 %222, %v76_v13   ;;  %v62_v13 = vld [vmem:[#allocation7 + $0x10] sm:$0xff] }
  0xfd   :  { %v80_v14 = vpop.permute.xlu0 %79 }
  0xfe   :  { %v82_v15 = vsub.f32 %v377_v0, %v80_v14  ;;  %v83_v16 = vsub.f32 %v379_v1, %v80_v14  ;;  %v63_v14 = vld [vmem:[#allocation7 + $0x18] sm:$0xff] }
  0xff   :  { %v127_v7 = vmul.f32 %v63_v14, %v396_v20 }
 0x100   :  { %v84_v17 = vmul.f32 %v82_v15, %v82_v15  ;;  %v85_v18 = vmul.f32 %v83_v16, %v83_v16 }
 0x102   :  { %v86_v23 = vadd.f32 %v85_v18, %v84_v17 }
 0x104   :  { %87 = vadd.xlane.f32.xlu1 %v86_v23 }
 0x10c   :  { %123 = vadd.xlane.f32.xlu1 %v122_v26 }
 0x177   :  { %v88_v28 = vpop.xlane.xlu1 %87 }
 0x178   :  { %v89_v29 = vrot.slane %v88_v28, 1  ;;  %v90_v30 = vrot.slane %v88_v28, 7 }
 0x17a   :  { %v91_v31 = vsel %vm386_vm0, %v89_v29, %v90_v30 }
 0x17b   :  { %v92_v32 = vadd.f32 %v91_v31, %v88_v28 }
 0x17d   :  { %v93_v33 = vmul.f32 0.001953125, %v92_v32 }
 0x17f   :  { %v94_v35 = vadd.f32 1e-05, %v93_v33  ;;  %v124_v36 = vpop.xlane.xlu1 %123 }
 0x180   :  { %v125_v37 = vadd.f32 %v124_v36, %v402_v34 }
 0x181   :  { %229 = vrsqrt.f32 %v94_v35  ;;  %vm101_vm2 = vweird.f32 %v94_v35 }
 0x182   :  { %134 = vperm.xlu1 %225, %v125_v37  }
 0x187   :  { %v230_v38 = vpop.eup %229 }
 0x188   :  { %v96_v39 = vmul.f32 %v230_v38, %v94_v35  ;;  %vm102_vm1 = vweird.f32 %v230_v38 }
 0x189   :  { %vm103_vm3 = vmor %vm101_vm2, %vm102_vm1 }
 0x18a   :  { %v97_v40 = vmul.f32 %v230_v38, %v96_v39 }
 0x18c   :  { %v98_v41 = vmul.f32 0.5, %v97_v40 }
 0x18e   :  { %v99_v42 = vsub.f32 1.5, %v98_v41 }
 0x190   :  { %v100_v43 = vmul.f32 %v230_v38, %v99_v42 }
 0x192   :  { %v104_v44 = vsel %vm103_vm3, %v230_v38, %v100_v43 }
 0x193   :  { %v105_v45 = vmul.f32 %v104_v44, %v402_v34 }
 0x195   :  { %108 = vperm.xlu2 %223, %v105_v45  }
 0x19d   :  { %224 = vset.pattern.permute.xlu2 %v344_v46 }
 0x19e   :  { %115 = vperm.xlu2 %224, %v402_v34  }
 0x1a6   :  { %226 = vset.pattern.permute.xlu2 %v345_v27 }
 0x1ef   :  { %v109_v47 = vpop.permute.xlu2 %108 }
 0x1f0   :  { %v111_v48 = vmul.f32 %v109_v47, %v82_v15  ;;  %v112_v49 = vmul.f32 %v109_v47, %v83_v16  ;;  %v126_v15 = vmul.f32 %v62_v13, %v394_v19  ;;  %v346_v19 = vmov 4  }
 0x1f1   :  { %228 = vset.pattern.permute.xlu0 %v346_v19 }
 0x1f2   :  { %v128_v16 = vadd.f32 %v127_v7, %v126_v15 }
 0x1f4   :  { %v135_v51 = vpop.permute.xlu1 %134  ;;  %129 = vadd.xlane.f32.xlu0 %v128_v16 }
 0x1f8   :  { %v116_v50 = vpop.permute.xlu2 %115 }
 0x1f9   :  { %v118_v52 = vadd.f32 %v116_v50, %v111_v48  ;;  %v119_v53 = vadd.f32 %v116_v50, %v112_v49 }
 0x1fb   :  { %v137_v54 = vmul.f32 %v135_v51, %v118_v52  ;;  %v138_v55 = vmul.f32 %v135_v51, %v119_v53 }
 0x1fd   :  { %v139_v57 = vrot.slane %v137_v54, 1  ;;  %v140_v58 = vrot.slane %v138_v55, 1  ;;  %v141_v59 = vrot.slane %v137_v54, 7  ;;  %v142_v60 = vrot.slane %v138_v55, 7 }
 0x1ff   :  { %v145_v61 = vsel %vm386_vm0, %v139_v57, %v141_v59  ;;  %v146_v62 = vsel %vm386_vm0, %v140_v58, %v142_v60 }
 0x200   :  { %v147_v63 = vadd.f32 %v145_v61, %v137_v54  ;;  %v148_v2 = vadd.f32 %v146_v62, %v138_v55 }
 0x202   :  { %v149_v3 = vrot.slane %v147_v63, 2  ;;  %v150_v4 = vrot.slane %v148_v2, 2  ;;  %v151_v6 = vrot.slane %v147_v63, 6  ;;  %v152_v8 = vrot.slane %v148_v2, 6 }
 0x204   :  { %v157_v9 = vsel %vm154_vm4, %v149_v3, %v151_v6  ;;  %v158_v10 = vsel %vm154_vm4, %v150_v4, %v152_v8 }
 0x205   :  { %v159_v5 = vadd.f32 %v157_v9, %v147_v63  ;;  %v160_v11 = vadd.f32 %v158_v10, %v148_v2 }
 0x207   :  { %v161_v12 = vmax.f32 %v159_v5, %v160_v11 }
 0x209   :  { %162 = vmax.xlane.f32.xlu2 %v161_v12 }
 0x221   :  { %178 = vperm.xlu2 %226, %v402_v34  }
 0x229   :  { %227 = vset.pattern.permute.xlu2 %v346_v19 }
 0x267   :  { %v130_v29 = vpop.xlane.xlu0 %129 }
 0x268   :  { %v131_v32 = vadd.f32 %v130_v29, %v402_v34 }
 0x27c   :  { %v163_v17 = vpop.xlane.xlu2 %162 }
 0x27d   :  { %v164_v18 = vsub.f32 %v159_v5, %v163_v17  ;;  %v165_v21 = vsub.f32 %v160_v11, %v163_v17 }
 0x27f   :  { %v166_v22 = vmul.f32 1.442695, %v164_v18  ;;  %v168_v23 = vmul.f32 1.442695, %v165_v21 }
 0x281   :  { %231 = vpow2.f32 %v166_v22 }
 0x282   :  { %233 = vpow2.f32 %v168_v23 }
 0x284   :  { %v179_v36 = vpop.permute.xlu2 %178 }
 0x285   :  { %v181_v38 = vadd.f32 %v179_v36, %v377_v0  ;;  %v182_v39 = vadd.f32 %v179_v36, %v379_v1 }
 0x287   :  { %v232_v24 = vpop.eup %231 }
 0x288   :  { %v234_v25 = vpop.eup %233 }
 0x289   :  { %v170_v26 = vadd.f32 %v234_v25, %v232_v24 }
 0x28b   :  { %171 = vadd.xlane.f32.xlu1 %v170_v26 }
 0x2fe   :  { %v172_v20 = vpop.xlane.xlu1 %171 }
 0x2ff   :  { %235 = vrcp.f32 %v172_v20 }
 0x305   :  { %v236_v28 = vpop.eup %235 }
 0x306   :  { %v174_v30 = vmul.f32 %v236_v28, %v172_v20 }
 0x308   :  { %v175_v31 = vsub.f32 2.0, %v174_v30 }
 0x30a   :  { %v176_v33 = vmul.f32 %v236_v28, %v175_v31 }
 0x30c   :  { %v183_v35 = vmul.f32 %v176_v33, %v131_v32 }
 0x30e   :  { %186 = vperm.xlu2 %227, %v183_v35  }
 0x368   :  { %v187_v37 = vpop.permute.xlu2 %186 }
 0x369   :  { %v189_v40 = vmul.f32 %v232_v24, %v187_v37  ;;  %v190_v41 = vmul.f32 %v234_v25, %v187_v37 }
 0x36b   :  { %v191_v42 = vadd.f32 %v189_v40, %v181_v38  ;;  %v192_v43 = vadd.f32 %v190_v41, %v182_v39 }
 0x36d   :  { %193 = vst [vmem:[#allocation8] sm:$0xff] %v191_v42 }
 0x36e   :  { %194 = vst [vmem:[#allocation8 + $0x8] sm:$0xff] %v192_v43 }
 0x36f   :  { %205 = dma.vmem_to_hbm [thread:$0]  %s201_s2, 256, %s203_s28, [#allocation4]  }
 0x370   :  { %337 = dma.done.wait [#allocation4], 256  }
 0x371   :  { %338 = vsyncadd [#allocation4], 4294967040 }
 0x372   :  { %210 = vsyncpa [#allocation3], 1 }
 0x373   :  { %211 = vsyncpa [#allocation6], 1 }
 0x374   :  { %212 = vsyncpa [#allocation4], 1 }

</bundles_post_ra>
